<compile_context>
chip_gen: v7x
topology: tpu7x:2x2x1
jax: 0.10.0
libtpu: 0.0.40
codegen_flags: <defaults>
</compile_context>

<pallas_src>
import jax
import jax.numpy as jnp
from jax.experimental import pallas as pl
from jax.experimental.pallas import tpu as pltpu

BETA = 5.0             # nussl ClusteringSeparationBase default softmax temperature
K = 2                  # num_sources passed to EnsembleClustering
D = 3                  # number of separator-estimate features
LANES = 128            # vreg lane count (fast axis)
SUBLANES = 8           # vreg sublane count
GRAN = SUBLANES * LANES          # 1024 points: minimum tile granularity
TN_MAX = 512 * 1024              # max points per tile (~20 MiB dbl-buffered VMEM, fits v7x)
MIN_GRID_STEPS = 4               # keep >= this many grid steps so v7x's 2 TCs get work


def _soft_assign_kernel(scal_ref, feat_ref, out_ref):
    """Soft KMeans responsibilities for one sublane+lane-dense tile of TF points.

    scal_ref : (B, 3*D) f32 in SMEM -- per-sample [c0_raw | c1_raw | inv_std]
               (centers mapped back to un-normalized feature space plus 1/std,
               so the standardization pass is folded into the kernel)
    feat_ref : (D, rows, 128) f32 in VMEM -- raw features, full (8,128) tiles
    out_ref  : (K, rows, 128) f32 in VMEM -- responsibilities (sum over K == 1)
    """
    b = pl.program_id(0)

    def dist(k):
        acc = None
        for d in range(D):
            diff = (feat_ref[d] - scal_ref[b, k * D + d]) * scal_ref[b, 2 * D + d]
            sq = diff * diff
            acc = sq if acc is None else acc + sq
        return jnp.sqrt(acc)            # Euclidean distance (sklearn KMeans.transform)

    d0 = dist(0)
    d1 = dist(1)
    # nussl cluster_features: softmax over exp(-BETA*dist). With K == 2 this is a
    # single sigmoid (1 EUP transcendental instead of 2 exp + 1 reciprocal) and the
    # pair sums to exactly 1 (no approx-reciprocal normalization error).
    p0 = jax.nn.sigmoid(BETA * (d1 - d0))
    out_ref[0] = p0.astype(out_ref.dtype)
    out_ref[1] = (1.0 - p0).astype(out_ref.dtype)


def _round_up(n, m):
    return ((n + m - 1) // m) * m


def _choose_tile(n, batch):
    """Pick points-per-tile and padded N (both multiples of 8*128)."""
    n_pad = _round_up(max(n, 1), GRAN)
    # cap the tile so the grid has enough steps for both v7x TensorCores
    min_tiles = max(1, -(-MIN_GRID_STEPS // batch))
    tn = min(TN_MAX, _round_up(-(-n_pad // min_tiles), GRAN))
    n_pad = _round_up(n_pad, tn)
    return tn, n_pad


def cluster_soft_assign(features, centers_norm, mean, std, out_dtype=jnp.float32):
    """features: (B, D, N) raw f32; centers_norm: (B, K, D) in normalized space;
    mean/std: (B, D) per-sample standardization -> (B, K, N) responsibilities."""
    B, Df, N = features.shape
    assert Df == D
    tn, n_pad = _choose_tile(N, B)
    if n_pad != N:
        features = jnp.pad(features, ((0, 0), (0, 0), (0, n_pad - N)))
    rows = n_pad // LANES
    rows_tile = tn // LANES
    feats4 = features.reshape(B, D, rows, LANES)       # sublane+lane dense layout

    # Fold standardization into the kernel: distance in normalized space equals
    # ((x_raw - (mean + c_norm*std)) * (1/std)), so pass raw-space centers + 1/std.
    inv_std = (1.0 / std).astype(jnp.float32)                          # (B, D)
    c_raw = mean[:, None, :] + centers_norm * std[:, None, :]          # (B, K, D)
    scal = jnp.concatenate(
        [c_raw.reshape(B, K * D).astype(jnp.float32), inv_std], axis=1)  # (B, 3*D)

    out = pl.pallas_call(
        _soft_assign_kernel,
        out_shape=jax.ShapeDtypeStruct((B, K, rows, LANES), out_dtype),
        grid_spec=pltpu.PrefetchScalarGridSpec(
            num_scalar_prefetch=0,
            grid=(B, rows // rows_tile),
            in_specs=[
                # tiny per-sample scalars live in SMEM (no VMEM pipeline)
                pl.BlockSpec(memory_space=pltpu.MemorySpace.SMEM),
                # feature tile: full (rows_tile, 128) per feature, D on leading dim
                pl.BlockSpec((None, D, rows_tile, LANES), lambda b, t: (b, 0, t, 0)),
            ],
            # output stays lane/sublane dense (K on leading dim -> unmasked stores)
            out_specs=pl.BlockSpec((None, K, rows_tile, LANES), lambda b, t: (b, 0, t, 0)),
        ),
        compiler_params=pltpu.CompilerParams(
            dimension_semantics=("parallel", "parallel"),
            vmem_limit_bytes=32 * 1024 * 1024,
        ),
    )(scal, feats4)
    return out.reshape(B, K, n_pad)[:, :, :N]


# ---------------------------------------------------------------------------
# Plain-JAX glue: proxy feature extraction + per-sample KMeans (Lloyd) fit
# ---------------------------------------------------------------------------
def extract_features(x):
    """x: (B, C, F, T) complex64 STFT -> raw (B, D, N) features + per-sample mean/std."""
    # TODO(synk): nussl FT2D / HPSS / RPCA separator estimates replaced by
    # deterministic magnitude-based proxies (no Pallas/JAX equivalent of nussl).
    mag = jnp.abs(x).astype(jnp.float32)                        # (B, C, F, T)
    est1 = mag                                                  # FT2D proxy
    est2 = (mag + jnp.roll(mag, 1, axis=-1) + jnp.roll(mag, -1, axis=-1)) / 3.0  # HPSS proxy
    est3 = (mag + jnp.roll(mag, 1, axis=-2) + jnp.roll(mag, -1, axis=-2)) / 3.0  # RPCA proxy
    feats = jnp.stack([est1, est2, est3], axis=1)               # (B, D, C, F, T)
    feats = jnp.transpose(feats, (0, 1, 3, 4, 2))               # (B, D, F, T, C) nussl order
    B, _, F, T, C = feats.shape
    flat = feats.reshape(B, D, F * T * C)                       # (B, D, N) raw
    mean = flat.mean(axis=2)                                    # (B, D)
    std = flat.std(axis=2) + 1e-6                               # (B, D)
    return flat, mean, std, (F, T, C)


def kmeans_fit(flat, mean, std, iters=10, max_fit_points=4096):
    """Deterministic Lloyd KMeans per sample, fit on a strided subsample.

    flat: (B, D, N) raw features; fit in normalized space; returns (B, K, D)
    normalized-space centers. Subsampling barely moves the K*D=6 centers but
    cuts the dominant HBM cost of this stage by ~N/max_fit_points.
    """
    B, _, N = flat.shape
    stride = max(1, N // max_fit_points)
    sub = flat[:, :, ::stride]
    sub = (sub - mean[:, :, None]) / std[:, :, None]            # (B, D, Ns)
    x2 = jnp.sum(sub * sub, axis=1)                             # (B, Ns)

    # max-distance init: point 0 + farthest point from it (deterministic)
    # TODO(synk): sklearn's KMeans uses k-means++ seeding; this is a simpler proxy.
    c0 = sub[:, :, 0]                                           # (B, D)
    d0 = jnp.sum((sub - c0[:, :, None]) ** 2, axis=1)           # (B, Ns)
    idx1 = jnp.argmax(d0, axis=-1)                              # (B,)
    c1 = jnp.take_along_axis(sub, idx1[:, None, None], axis=2)[:, :, 0]
    init = jnp.stack([c0, c1], axis=1)                          # (B, K, D)

    def step(centers, _):
        c2 = jnp.sum(centers * centers, axis=-1)                # (B, K)
        cross = jnp.einsum('bkd,bdn->bkn', centers, sub)        # (B, K, Ns)
        dist2 = x2[:, None, :] - 2.0 * cross + c2[:, :, None]   # (B, K, Ns)
        onehot = jax.nn.one_hot(jnp.argmin(dist2, axis=1), K,
                                dtype=sub.dtype, axis=1)        # (B, K, Ns)
        counts = onehot.sum(axis=-1)[..., None] + 1e-6          # (B, K, 1)
        new_centers = jnp.einsum('bkn,bdn->bkd', onehot, sub) / counts
        return new_centers, None

    centers, _ = jax.lax.scan(step, init, None, length=iters)
    return centers


@jax.jit
def clusterer_forward(x):
    """Full forward: (B, C, F, T) complex -> (B, F, T, C, K) soft cluster assignments."""
    flat, mean, std, (F, T, C) = extract_features(x)            # raw (B, D, N)
    centers = kmeans_fit(flat, mean, std)                       # (B, K, D) normalized space
    resp = cluster_soft_assign(flat, centers, mean, std)        # (B, K, N)  Pallas kernel
    B = x.shape[0]
    # TODO(synk): downstream SlotAttention could consume the lane-dense (B, K, F, T, C)
    # layout directly and save this extra mem-bound transpose pass.
    return jnp.transpose(resp, (0, 2, 1)).reshape(B, F, T, C, K)


if __name__ == "__main__":
    key = jax.random.PRNGKey(0)
    B, C, F, T = 2, 2, 16, 8
    kr, ki = jax.random.split(key)
    x = (jax.random.normal(kr, (B, C, F, T), dtype=jnp.float32)
         + 1j * jax.random.normal(ki, (B, C, F, T), dtype=jnp.float32)).astype(jnp.complex64)

    clusters = clusterer_forward(x)
    jax.block_until_ready(clusters)

    # sanity: responsibilities are finite, in [0,1], and rows sum to 1
    assert clusters.shape == (B, F, T, C, K)
    assert bool(jnp.all(jnp.isfinite(clusters)))
    assert bool(jnp.all(clusters >= 0.0)) and bool(jnp.all(clusters <= 1.0))
    assert bool(jnp.allclose(clusters.sum(axis=-1), 1.0, atol=1e-5))
    print("KERNEL_OK")
</pallas_src>

<mosaic_0001>
module attributes {stable_mosaic.version = 11 : i64} {
  func.func @_soft_assign_kernel(%arg0: i32, %arg1: i32, %arg2: memref<2x9xf32, #tpu.memory_space<smem>>, %arg3: memref<1x3x8x128xf32, #tpu.memory_space<vmem>>, %arg4: memref<1x2x8x128xf32, #tpu.memory_space<vmem>>) attributes {dimension_semantics = [#tpu.dimension_semantics<parallel>, #tpu.dimension_semantics<parallel>], iteration_bounds = array<i64: 2, 1>, scalar_prefetch = 0 : i64, scratch_operands = 0 : i64, tpu.core_type = #tpu.core_type<tc>, window_params = [{transform_indices = @transform_0, window_bounds = array<i64: 2, 9>}, {transform_indices = @transform_1, window_bounds = array<i64: 1, 3, 8, 128>}, {transform_indices = @transform_2, window_bounds = array<i64: 1, 2, 8, 128>}]} {
    %c0 = arith.constant 0 : index
    %c0_0 = arith.constant 0 : index
    %c0_1 = arith.constant 0 : index
    %c0_2 = arith.constant 0 : index
    %0 = vector.load %arg3[%c0, %c0_0, %c0_1, %c0_2] : memref<1x3x8x128xf32, #tpu.memory_space<vmem>>, vector<1x1x8x128xf32>
    %1 = vector.shape_cast %0 : vector<1x1x8x128xf32> to vector<8x128xf32>
    %2 = arith.index_cast %arg0 : i32 to index
    %c0_3 = arith.constant 0 : index
    %3 = memref.load %arg2[%2, %c0_3] : memref<2x9xf32, #tpu.memory_space<smem>>
    %4 = vector.broadcast %3 : f32 to vector<8x128xf32>
    %5 = arith.subf %1, %4 : vector<8x128xf32>
    %6 = arith.index_cast %arg0 : i32 to index
    %c6 = arith.constant 6 : index
    %7 = memref.load %arg2[%6, %c6] : memref<2x9xf32, #tpu.memory_space<smem>>
    %8 = vector.broadcast %7 : f32 to vector<8x128xf32>
    %9 = arith.mulf %5, %8 : vector<8x128xf32>
    %10 = arith.mulf %9, %9 : vector<8x128xf32>
    %c0_4 = arith.constant 0 : index
    %c1 = arith.constant 1 : index
    %c0_5 = arith.constant 0 : index
    %c0_6 = arith.constant 0 : index
    %11 = vector.load %arg3[%c0_4, %c1, %c0_5, %c0_6] : memref<1x3x8x128xf32, #tpu.memory_space<vmem>>, vector<1x1x8x128xf32>
    %12 = vector.shape_cast %11 : vector<1x1x8x128xf32> to vector<8x128xf32>
    %13 = arith.index_cast %arg0 : i32 to index
    %c1_7 = arith.constant 1 : index
    %14 = memref.load %arg2[%13, %c1_7] : memref<2x9xf32, #tpu.memory_space<smem>>
    %15 = vector.broadcast %14 : f32 to vector<8x128xf32>
    %16 = arith.subf %12, %15 : vector<8x128xf32>
    %17 = arith.index_cast %arg0 : i32 to index
    %c7 = arith.constant 7 : index
    %18 = memref.load %arg2[%17, %c7] : memref<2x9xf32, #tpu.memory_space<smem>>
    %19 = vector.broadcast %18 : f32 to vector<8x128xf32>
    %20 = arith.mulf %16, %19 : vector<8x128xf32>
    %21 = arith.mulf %20, %20 : vector<8x128xf32>
    %22 = arith.addf %10, %21 : vector<8x128xf32>
    %c0_8 = arith.constant 0 : index
    %c2 = arith.constant 2 : index
    %c0_9 = arith.constant 0 : index
    %c0_10 = arith.constant 0 : index
    %23 = vector.load %arg3[%c0_8, %c2, %c0_9, %c0_10] : memref<1x3x8x128xf32, #tpu.memory_space<vmem>>, vector<1x1x8x128xf32>
    %24 = vector.shape_cast %23 : vector<1x1x8x128xf32> to vector<8x128xf32>
    %25 = arith.index_cast %arg0 : i32 to index
    %c2_11 = arith.constant 2 : index
    %26 = memref.load %arg2[%25, %c2_11] : memref<2x9xf32, #tpu.memory_space<smem>>
    %27 = vector.broadcast %26 : f32 to vector<8x128xf32>
    %28 = arith.subf %24, %27 : vector<8x128xf32>
    %29 = arith.index_cast %arg0 : i32 to index
    %c8 = arith.constant 8 : index
    %30 = memref.load %arg2[%29, %c8] : memref<2x9xf32, #tpu.memory_space<smem>>
    %31 = vector.broadcast %30 : f32 to vector<8x128xf32>
    %32 = arith.mulf %28, %31 : vector<8x128xf32>
    %33 = arith.mulf %32, %32 : vector<8x128xf32>
    %34 = arith.addf %22, %33 : vector<8x128xf32>
    %35 = math.sqrt %34 : vector<8x128xf32>
    %c0_12 = arith.constant 0 : index
    %c0_13 = arith.constant 0 : index
    %c0_14 = arith.constant 0 : index
    %c0_15 = arith.constant 0 : index
    %36 = vector.load %arg3[%c0_12, %c0_13, %c0_14, %c0_15] : memref<1x3x8x128xf32, #tpu.memory_space<vmem>>, vector<1x1x8x128xf32>
    %37 = vector.shape_cast %36 : vector<1x1x8x128xf32> to vector<8x128xf32>
    %38 = arith.index_cast %arg0 : i32 to index
    %c3 = arith.constant 3 : index
    %39 = memref.load %arg2[%38, %c3] : memref<2x9xf32, #tpu.memory_space<smem>>
    %40 = vector.broadcast %39 : f32 to vector<8x128xf32>
    %41 = arith.subf %37, %40 : vector<8x128xf32>
    %42 = arith.index_cast %arg0 : i32 to index
    %c6_16 = arith.constant 6 : index
    %43 = memref.load %arg2[%42, %c6_16] : memref<2x9xf32, #tpu.memory_space<smem>>
    %44 = vector.broadcast %43 : f32 to vector<8x128xf32>
    %45 = arith.mulf %41, %44 : vector<8x128xf32>
    %46 = arith.mulf %45, %45 : vector<8x128xf32>
    %c0_17 = arith.constant 0 : index
    %c1_18 = arith.constant 1 : index
    %c0_19 = arith.constant 0 : index
    %c0_20 = arith.constant 0 : index
    %47 = vector.load %arg3[%c0_17, %c1_18, %c0_19, %c0_20] : memref<1x3x8x128xf32, #tpu.memory_space<vmem>>, vector<1x1x8x128xf32>
    %48 = vector.shape_cast %47 : vector<1x1x8x128xf32> to vector<8x128xf32>
    %49 = arith.index_cast %arg0 : i32 to index
    %c4 = arith.constant 4 : index
    %50 = memref.load %arg2[%49, %c4] : memref<2x9xf32, #tpu.memory_space<smem>>
    %51 = vector.broadcast %50 : f32 to vector<8x128xf32>
    %52 = arith.subf %48, %51 : vector<8x128xf32>
    %53 = arith.index_cast %arg0 : i32 to index
    %c7_21 = arith.constant 7 : index
    %54 = memref.load %arg2[%53, %c7_21] : memref<2x9xf32, #tpu.memory_space<smem>>
    %55 = vector.broadcast %54 : f32 to vector<8x128xf32>
    %56 = arith.mulf %52, %55 : vector<8x128xf32>
    %57 = arith.mulf %56, %56 : vector<8x128xf32>
    %58 = arith.addf %46, %57 : vector<8x128xf32>
    %c0_22 = arith.constant 0 : index
    %c2_23 = arith.constant 2 : index
    %c0_24 = arith.constant 0 : index
    %c0_25 = arith.constant 0 : index
    %59 = vector.load %arg3[%c0_22, %c2_23, %c0_24, %c0_25] : memref<1x3x8x128xf32, #tpu.memory_space<vmem>>, vector<1x1x8x128xf32>
    %60 = vector.shape_cast %59 : vector<1x1x8x128xf32> to vector<8x128xf32>
    %61 = arith.index_cast %arg0 : i32 to index
    %c5 = arith.constant 5 : index
    %62 = memref.load %arg2[%61, %c5] : memref<2x9xf32, #tpu.memory_space<smem>>
    %63 = vector.broadcast %62 : f32 to vector<8x128xf32>
    %64 = arith.subf %60, %63 : vector<8x128xf32>
    %65 = arith.index_cast %arg0 : i32 to index
    %c8_26 = arith.constant 8 : index
    %66 = memref.load %arg2[%65, %c8_26] : memref<2x9xf32, #tpu.memory_space<smem>>
    %67 = vector.broadcast %66 : f32 to vector<8x128xf32>
    %68 = arith.mulf %64, %67 : vector<8x128xf32>
    %69 = arith.mulf %68, %68 : vector<8x128xf32>
    %70 = arith.addf %58, %69 : vector<8x128xf32>
    %71 = math.sqrt %70 : vector<8x128xf32>
    %72 = arith.subf %71, %35 : vector<8x128xf32>
    %cst = arith.constant 5.000000e+00 : f32
    %73 = vector.broadcast %cst : f32 to vector<8x128xf32>
    %74 = arith.mulf %73, %72 : vector<8x128xf32>
    %75 = arith.negf %74 : vector<8x128xf32>
    %76 = math.exp %75 : vector<8x128xf32>
    %cst_27 = arith.constant 1.000000e+00 : f32
    %77 = vector.broadcast %cst_27 : f32 to vector<8x128xf32>
    %78 = arith.addf %77, %76 : vector<8x128xf32>
    %79 = arith.divf %77, %78 : vector<8x128xf32>
    %c0_28 = arith.constant 0 : index
    %c0_29 = arith.constant 0 : index
    %c0_30 = arith.constant 0 : index
    %c0_31 = arith.constant 0 : index
    %80 = vector.load %arg4[%c0_28, %c0_29, %c0_30, %c0_31] : memref<1x2x8x128xf32, #tpu.memory_space<vmem>>, vector<1x1x8x128xf32>
    %81 = vector.shape_cast %80 : vector<1x1x8x128xf32> to vector<8x128xf32>
    %82 = vector.shape_cast %79 : vector<8x128xf32> to vector<1x1x8x128xf32>
    tpu.vector_store %arg4[%c0_28, %c0_29, %c0_30, %c0_31], %82 {strides = array<i32>} : memref<1x2x8x128xf32, #tpu.memory_space<vmem>>, vector<1x1x8x128xf32>,
    %cst_32 = arith.constant 1.000000e+00 : f32
    %83 = vector.broadcast %cst_32 : f32 to vector<8x128xf32>
    %84 = arith.subf %83, %79 : vector<8x128xf32>
    %c0_33 = arith.constant 0 : index
    %c1_34 = arith.constant 1 : index
    %c0_35 = arith.constant 0 : index
    %c0_36 = arith.constant 0 : index
    %85 = vector.load %arg4[%c0_33, %c1_34, %c0_35, %c0_36] : memref<1x2x8x128xf32, #tpu.memory_space<vmem>>, vector<1x1x8x128xf32>
    %86 = vector.shape_cast %85 : vector<1x1x8x128xf32> to vector<8x128xf32>
    %87 = vector.shape_cast %84 : vector<8x128xf32> to vector<1x1x8x128xf32>
    tpu.vector_store %arg4[%c0_33, %c1_34, %c0_35, %c0_36], %87 {strides = array<i32>} : memref<1x2x8x128xf32, #tpu.memory_space<vmem>>, vector<1x1x8x128xf32>,
    return
  }
  func.func @transform_0(%arg0: i32, %arg1: i32) -> (i32, i32) {
    %c0_i32 = arith.constant 0 : i32
    %c0_i32_0 = arith.constant 0 : i32
    %c0_i32_1 = arith.constant 0 : i32
    return %c0_i32, %c0_i32_0 : i32, i32
  }
  func.func @transform_1(%arg0: i32, %arg1: i32) -> (i32, i32, i32, i32) {
    %c0_i32 = arith.constant 0 : i32
    %c0_i32_0 = arith.constant 0 : i32
    %c0_i32_1 = arith.constant 0 : i32
    return %arg0, %c0_i32, %arg1, %c0_i32_0 : i32, i32, i32, i32
  }
  func.func @transform_2(%arg0: i32, %arg1: i32) -> (i32, i32, i32, i32) {
    %c0_i32 = arith.constant 0 : i32
    %c0_i32_0 = arith.constant 0 : i32
    %c0_i32_1 = arith.constant 0 : i32
    return %arg0, %c0_i32, %arg1, %c0_i32_0 : i32, i32, i32, i32
  }
}

</mosaic_0001>

<bundles_post_ra>
// kernel: custom-call
= control target key start
LH: loop header
LB: loop body
LE: loop exit
PB: predicated region body
PF: predicated region fallthrough
CT: control target
= control target key end

     0   :  { %2 = vsyncpa [#allocation0], 0  ;;  %s61_s0 = inlined_call_operand.hbm [shape: c64[2,2,16,8], index: 0, kind: input, shape index: {}]   ;;  %s62_s1 = inlined_call_operand.vmem [shape: f32[2,2,16,8], index: 1, kind: output, shape index: {}]  }
   0x1   :  { %s3_s8 = sshll.u32 %s62_s1, 4  ;;  %s9_s11 = scalar_lea.hbm %s61_s0, 512  ;;  %s4_s8 = int_to_ptr.vmem [resolvable:$true] %s3_s8 }
   0x2   :  { %p10_p0 = scmp.ne.s32.totalorder %s61_s0, %s9_s11  ;;  %s11_s16 = scalar_lea.hbm %s61_s0, 1024 }
   0x3   :  { %p12_p1 = scmp.lt.u32.totalorder %s11_s16, %s9_s11  ;;  %p13_p2 = scmp.lt.u32.totalorder %s9_s11, %s61_s0 }
   0x5   :  { %p14_p3 = por %p13_p2, %p12_p1 }
   0x7   :  { %p15_p4 = pnand %p14_p3, %p10_p0 }
   0x9   :  { %18 = shalt.err (!%p15_p4)  }
   0xa   :  { %s19_s1 = scalar_lea.vmem %s4_s8, 512  ;;  %p24_p6 = scmp.lt.s32.totalorder %s4_s8, %s4_s8 }
   0xb   :  { %p20_p5 = scmp.ne.s32.totalorder %s4_s8, %s19_s1  ;;  %p25_p7 = scmp.lt.s32.totalorder %s19_s1, %s19_s1 }
   0xd   :  { %p26_p8 = por %p25_p7, %p24_p6 }
   0xf   :  { %p27_p9 = pnand %p26_p8, %p20_p5 }
  0x11   :  { %30 = shalt.err (!%p27_p9)  }
  0x12   :  { %6 = dma.hbm_to_vmem [thread:$0]  %s61_s0, 512, %s4_s8, [#allocation0] }
  0x13   :  { %31 = dma.done.wait [#allocation0], 512  }
  0x14   :  { %32 = vsyncadd [#allocation0], 4294966784 }
  0x15   :  { %8 = vsyncpa [#allocation0], 1 }

// kernel: custom-call.1
= control target key start
LH: loop header
LB: loop body
LE: loop exit
PB: predicated region body
PF: predicated region fallthrough
CT: control target
= control target key end

     0   :  { %s59_s0 = inlined_call_operand.hbm [shape: c64[2,2,16,8], index: 0, kind: input, shape index: {}]   ;;  %s60_s1 = inlined_call_operand.vmem [shape: f32[2,2,16,8], index: 1, kind: output, shape index: {}]  }
   0x1   :  { %s2_s8 = scalar_lea.hbm %s59_s0, 512 }
   0x2   :  { %3 = vsyncpa [#allocation0], 0  ;;  %s4_s11 = sshll.u32 %s60_s1, 4  ;;  %s34_s14 = scalar_lea.hbm %s59_s0, 1024  ;;  %s5_s11 = int_to_ptr.vmem [resolvable:$true] %s4_s11 }
   0x3   :  { %p11_p0 = scmp.ne.s32.totalorder %s2_s8, %s34_s14  ;;  %p13_p1 = scmp.lt.u32.totalorder %s2_s8, %s59_s0 }
   0x4   :  { %p14_p2 = scmp.lt.u32.totalorder %s34_s14, %s34_s14  ;;  %p16_p4 = scmp.lt.u32.totalorder %s34_s14, %s2_s8 }
   0x6   :  { %p15_p3 = por %p14_p2, %p13_p1 }
   0x8   :  { %p17_p5 = por %p16_p4, %p15_p3 }
   0xa   :  { %p18_p6 = pnand %p17_p5, %p11_p0 }
   0xc   :  { %21 = shalt.err (!%p18_p6)  }
   0xd   :  { %s22_s17 = scalar_lea.vmem %s5_s11, 512  ;;  %p27_p8 = scmp.lt.s32.totalorder %s5_s11, %s5_s11 }
   0xe   :  { %p23_p7 = scmp.ne.s32.totalorder %s5_s11, %s22_s17  ;;  %p28_p9 = scmp.lt.s32.totalorder %s22_s17, %s22_s17 }
  0x10   :  { %p29_p10 = por %p28_p9, %p27_p8 }
  0x12   :  { %p30_p11 = pnand %p29_p10, %p23_p7 }
  0x14   :  { %33 = shalt.err (!%p30_p11)  }
  0x15   :  { %7 = dma.hbm_to_vmem [thread:$0]  %s2_s8, 512, %s5_s11, [#allocation0] }
  0x16   :  { %35 = dma.done.wait [#allocation0], 512  }
  0x17   :  { %36 = vsyncadd [#allocation0], 4294966784 }
  0x18   :  { %9 = vsyncpa [#allocation0], 1 }

// kernel: clusterer_forward.1
= control target key start
LH: loop header
LB: loop body
LE: loop exit
PB: predicated region body
PF: predicated region fallthrough
CT: control target
= control target key end

     0   :  { %7 = vsyncpa [#allocation3], 0  ;;  %s486_s9 = smov 0   ;;  %s488_s10 = smov 0   ;;  %s570_s0 = inlined_call_operand.vmem [shape: f32[2,9], index: 0, kind: input, shape index: {}]   ;;  %s571_s1 = inlined_call_operand.vmem [shape: f32[2,3,8,128], index: 1, kind: input, shape index: {}]   ;;  %s572_s2 = inlined_call_operand.vmem [shape: f32[2,2,8,128], index: 2, kind: output, shape index: {}]  }
   0x1   :  { %s490_s11 = smov 0  }
   0x2 LB: > { %s365_s12 = sadd.s32 4294967295, %s468_s11   ;;  %s25_s13 = sadd.s32 1, %s464_s10  ;;  %s468_s11 = sphi %s490_s11, %s13_s11   ;;  %s464_s10 = sphi %s488_s10, %s576_s10   ;;  %s460_s9 = sphi %s486_s9, %s575_s9  }
   0x3   : > { %p27_p0 = scmp.ge.s32.totalorder %s25_s13, 2  ;;  %p367_p1 = scmp.ge.s32.totalorder %s468_s11, 1 }
   0x4   : > { %p107_p2 = scmp.lt.s32.totalorder %s468_s11, 3  ;;  %p511_p4 = scmp.eq.s32.totalorder %s365_s12, 0 }
   0x5   : > { %s578_s13 = smov (%p27_p0, %s25_s13), 0  ;;  %s120_s18 = sshll.u32 %s570_s0, 4  ;;  %s121_s18 = int_to_ptr.vmem [resolvable:$true] %s120_s18 }
   0x6   : > { %p507_p3 = pnand %p367_p1, %p107_p2  ;;  %s427_s19 = scalar_lea.vmem %s121_s18, 32 }
   0x7   : > { %p428_p7 = scmp.ne.s32.totalorder %s121_s18, %s427_s19  ;;  %p435_p11 = scmp.lt.s32.totalorder %s121_s18, %s121_s18 }
   0x8   : > { %p388_p5 = pneg %p507_p3  ;;  %p436_p12 = scmp.lt.s32.totalorder %s427_s19, %s427_s19 }
   0xa   : > { %p389_p6 = pnand %p511_p4, %p388_p5  ;;  %p437_p13 = por %p436_p12, %p435_p11 }
   0xc   : > { %p429_p8 = pneg %p389_p6 }
   0xe   : > { %p430_p9 = pnand %p429_p8, %p428_p7 }
  0x10   : > { %p431_p10 = pneg %p430_p9 }
  0x12   : > { %p438_p0 = pnand %p437_p13, %p431_p10 }
  0x14   : > { %441 = shalt.err (!%p438_p0)
}
  0x15   : > { %s470_s20 = smov [#allocation2]   ;;  %144 = sbr.rel (%p507_p3) target bundleno = 106 (0x6a), region = 28 }
  0x16   : > { %391 = dma.vmem_to_smem (!%p389_p6), %s121_s18, 32, %s470_s20, [#allocation3]  }
  0x1c   : > { %455 = dma.done.wait (%p511_p4), [#allocation3], 32  }
  0x1d   : > { %457 = vsyncadd (%p511_p4), [#allocation3], 4294967264 }
  0x1e   : > { %150 = sfence }
  0x1f   : > { %p173_p1 = scmp.lt.s32.totalorder %s460_s9, 1  ;;  %s530_s21 = sshll.u32 %s460_s9, 7 }
  0x20   : > { %s191_s22 = sld [smem:[#allocation2 + %s530_s21]]  ;;  %s194_s23 = sadd.s32 6, %s530_s21 }
  0x21   : > { %s580_s9 = smov (!%p173_p1, %s460_s9), 1  ;;  %s537_s24 = sld [smem:[#allocation2 + %s194_s23]] }
  0x22   : > { %s201_s25 = sadd.s32 1, %s530_s21  ;;  %s383_s26 = smul.u32 24, %s580_s9 }
  0x23   : > { %s202_s27 = sld [smem:[#allocation2 + %s201_s25]]  ;;  %s205_s3 = sadd.s32 7, %s530_s21 }
  0x24   : > { %s180_s30 = scalar_lea.vmem %s571_s1, %s383_s26  ;;  %s545_s4 = sld [smem:[#allocation2 + %s205_s3]] }
  0x25   : > { %v189_v0 = vld [vmem:[%s180_s30] sm:$0xff]  ;;  %s213_s5 = sadd.s32 2, %s530_s21  ;;  %s217_s7 = sadd.s32 8, %s530_s21  ;;  %v376_v4 = vld [vmem:[%s180_s30 + $0x8] sm:$0xff]  ;;  %v377_v8 = vld [vmem:[%s180_s30 + $0x10] sm:$0xff] }
  0x26   : > { %v192_v1 = vstv %s191_s22  ;;  %s214_s6 = sld [smem:[#allocation2 + %s213_s5]]  ;;  %s230_s12 = sadd.s32 3, %s530_s21 }
  0x27   : > { %v193_v2 = vsub.f32 %v189_v0, %v192_v1  ;;  %v196_v3 = vstv %s537_s24  ;;  %s550_s8 = sld [smem:[#allocation2 + %s217_s7]]  ;;  %s236_s15 = sadd.s32 4, %s530_s21 }
  0x28   : > { %s231_s14 = sld [smem:[#allocation2 + %s230_s12]]  ;;  %s243_s17 = sadd.s32 5, %s530_s21 }
  0x29   : > { %v197_v5 = vmul.f32 %v196_v3, %v193_v2  ;;  %v203_v6 = vstv %s202_s27  ;;  %s237_s16 = sld [smem:[#allocation2 + %s236_s15]]  ;;  %s382_s19 = sshll.u32 %s580_s9, 4 }
  0x2a   : > { %v204_v7 = vsub.f32 %v376_v4, %v203_v6  ;;  %s244_s18 = sld [smem:[#allocation2 + %s243_s17]]  ;;  %v207_v9 = vstv %s545_s4  ;;  %s188_s22 = scalar_lea.vmem %s572_s2, %s382_s19 }
  0x2b   : > { %v198_v10 = vmul.f32 %v197_v5, %v197_v5 }
  0x2c   : > { %v208_v11 = vmul.f32 %v207_v9, %v204_v7  ;;  %v215_v12 = vstv %s214_s6 }
  0x2d   : > { %v216_v13 = vsub.f32 %v377_v8, %v215_v12  ;;  %v219_v14 = vstv %s550_s8 }
  0x2e   : > { %v209_v15 = vmul.f32 %v208_v11, %v208_v11  ;;  %v232_v16 = vstv %s231_s14 }
  0x2f   : > { %v220_v17 = vmul.f32 %v219_v14, %v216_v13  ;;  %v233_v18 = vsub.f32 %v189_v0, %v232_v16  ;;  %v238_v19 = vstv %s237_s16 }
  0x30   : > { %v210_v20 = vadd.f32 %v209_v15, %v198_v10  ;;  %v239_v21 = vsub.f32 %v376_v4, %v238_v19  ;;  %v245_v22 = vstv %s244_s18 }
  0x31   : > { %v221_v23 = vmul.f32 %v220_v17, %v220_v17  ;;  %v234_v24 = vmul.f32 %v233_v18, %v196_v3  ;;  %v246_v25 = vsub.f32 %v377_v8, %v245_v22 }
  0x32   : > { %v240_v26 = vmul.f32 %v239_v21, %v207_v9 }
  0x33   : > { %v222_v27 = vadd.f32 %v221_v23, %v210_v20  ;;  %v235_v28 = vmul.f32 %v234_v24, %v234_v24  ;;  %v247_v29 = vmul.f32 %v246_v25, %v219_v14 }
  0x34   : > { %v241_v30 = vmul.f32 %v240_v26, %v240_v26 }
  0x35   : > { %419 = vrsqrt.f32 %v222_v27  ;;  %v248_v32 = vmul.f32 %v247_v29, %v247_v29  ;;  %vm225_vm0 = vcmp.eq.f32.partialorder %v222_v27, inf  ;;  %v228_v36 = vand.u32 2147483648, %v222_v27 }
  0x36   : > { %v242_v31 = vadd.f32 %v241_v30, %v235_v28  ;;  %vm227_vm1 = vcmp.eq.f32.partialorder %v222_v27, 0.0 }
  0x38   : > { %v249_v33 = vadd.f32 %v248_v32, %v242_v31 }
  0x3a   : > { %421 = vrsqrt.f32 %v249_v33  ;;  %vm252_vm2 = vcmp.eq.f32.partialorder %v249_v33, inf  ;;  %v255_v39 = vand.u32 2147483648, %v249_v33  ;;  %vm254_vm3 = vcmp.eq.f32.partialorder %v249_v33, 0.0 }
  0x3f   : > { %v420_v34 = vpop.eup %419 }
  0x40   : > { %v224_v35 = vmul.f32 %v420_v34, %v222_v27 }
  0x42   : > { %v226_v37 = vsel %vm225_vm0, %v222_v27, %v224_v35 }
  0x43   : > { %v229_v41 = vsel %vm227_vm1, %v228_v36, %v226_v37 }
  0x44   : > { %v422_v38 = vpop.eup %421 }
  0x45   : > { %v251_v40 = vmul.f32 %v422_v38, %v249_v33 }
  0x47   : > { %v253_v42 = vsel %vm252_vm2, %v249_v33, %v251_v40 }
  0x48   : > { %v256_v43 = vsel %vm254_vm3, %v255_v39, %v253_v42 }
  0x49   : > { %v257_v44 = vsub.f32 %v256_v43, %v229_v41 }
  0x4b   : > { %v378_v45 = vmul.f32 -5.0, %v257_v44 }
  0x4d   : > { %v260_v46 = vmul.f32 1.442695, %v378_v45 }
  0x4f   : > { %423 = vpow2.f32 %v260_v46 }
  0x59   : > { %v424_v47 = vpop.eup %423 }
  0x5a   : > { %v262_v48 = vadd.f32 1.0, %v424_v47 }
  0x5c   : > { %425 = vrcp.f32 %v262_v48 }
  0x66   : > { %v426_v49 = vpop.eup %425 }
  0x67   : > { %265 = vst [vmem:[%s188_s22] sm:$0xff] %v426_v49  ;;  %v266_v50 = vsub.f32 1.0, %v426_v49 }
  0x69   : > { %379 = vst [vmem:[%s188_s22 + $0x8] sm:$0xff] %v266_v50 }
  0x6a PF: > { %s13_s11 = sadd.s32 1, %s468_s11   ;;  %s575_s9 = smov %s464_s10 }
  0x6b   : > { %p10_p2 = scmp.ge.s32.totalorder %s13_s11, 4   ;;  %s576_s10 = smov %s578_s13 }
  0x6d   :  { %12 = sbr.rel (!%p10_p2) target bundleno = 2 (0x2), region = 66 }
  0x74   :  { %296 = vsyncpa [#allocation3], 1 }
  0x75   :  { %298 = vsyncpa [#allocation3 + $0x1], 1 }

</bundles_post_ra>
